<compile_context>
chip_gen: v7x
topology: tpu7x:2x2x1
jax: 0.10.0
libtpu: 0.0.40
codegen_flags: <defaults>
</compile_context>

<pallas_src>
import jax
import jax.numpy as jnp
from jax.experimental import pallas as pl
from jax.experimental.pallas import tpu as pltpu

N_COLS = 6
N_OPS = 2
N_ROWS = 6
N_ACTIONS = N_ROWS * N_COLS * N_OPS   # 72

INPUT_DIM = 72
HIDDEN_DIM = 128
OUTPUT_DIM = N_ACTIONS                # 72

MIN_TB = 8        # sublane granularity
MAX_TB = 1024     # max batch rows per grid step (amortizes per-step overhead)


def _cdiv(a: int, b: int) -> int:
    return -(-a // b)


def _round_up(x: int, m: int) -> int:
    return _cdiv(x, m) * m


def _choose_tiling(B: int):
    """Pick (TB, n_steps, Bp).

    - TB up to MAX_TB rows per step so the ~0.35 us/step overhead is amortized.
    - n_steps >= 2 and even whenever B >= 16 so v7x's two TensorCores both get
      balanced work (irrelevant but harmless on single-TC v5e/v6e).
    - TB adapted to B so batch padding waste stays small for awkward sizes.
    """
    if B < 2 * MIN_TB:
        n_target = 1
    else:
        n_target = max(2, _cdiv(B, MAX_TB))
        if n_target % 2:
            n_target += 1
    tb = min(MAX_TB, max(MIN_TB, _round_up(_cdiv(B, n_target), MIN_TB)))
    n_steps = _cdiv(B, tb)
    return tb, n_steps, tb * n_steps


def _dqn_kernel(x_ref, w1_ref, b1_ref, w2_ref, b2_ref, w3_ref, b3_ref, o_ref):
    # x tile: (TB, 72) f32 -> cast to bf16 in VMEM (no extra HBM pass).
    x = x_ref[...].astype(jnp.bfloat16)
    # Layer 1: (TB,72) @ (72,128) -> f32 acc, bias + ReLU in f32.
    h1 = jnp.dot(x, w1_ref[...], preferred_element_type=jnp.float32)
    h1 = jnp.maximum(h1 + b1_ref[...], 0.0)
    # Layer 2: (TB,128) @ (128,128)
    h2 = jnp.dot(h1.astype(jnp.bfloat16), w2_ref[...],
                 preferred_element_type=jnp.float32)
    h2 = jnp.maximum(h2 + b2_ref[...], 0.0)
    # Layer 3 (no activation): (TB,128) @ (128,72), stored as (TB,72) f32.
    out = jnp.dot(h2.astype(jnp.bfloat16), w3_ref[...],
                  preferred_element_type=jnp.float32) + b3_ref[...]
    o_ref[...] = out.astype(o_ref.dtype)


def init_params(key):
    """PyTorch nn.Linear-style init: U(-1/sqrt(fan_in), 1/sqrt(fan_in)).

    Weights stored transposed vs. PyTorch ((in, out)) so the kernel computes
    x @ W + b directly; biases are (1, out)."""
    ks = jax.random.split(key, 6)

    def linear(kw, kb, fan_in, fan_out):
        bound = 1.0 / jnp.sqrt(jnp.float32(fan_in))
        w = jax.random.uniform(kw, (fan_in, fan_out), jnp.float32, -bound, bound)
        b = jax.random.uniform(kb, (1, fan_out), jnp.float32, -bound, bound)
        return w, b

    w1, b1 = linear(ks[0], ks[1], INPUT_DIM, HIDDEN_DIM)
    w2, b2 = linear(ks[2], ks[3], HIDDEN_DIM, HIDDEN_DIM)
    w3, b3 = linear(ks[4], ks[5], HIDDEN_DIM, OUTPUT_DIM)
    return (w1, b1, w2, b2, w3, b3)


def prepare_params(params):
    """Cast weights to bf16 for the MXU (do once); biases stay f32."""
    w1, b1, w2, b2, w3, b3 = params
    bf = jnp.bfloat16
    return (w1.astype(bf), b1, w2.astype(bf), b2, w3.astype(bf), b3)


@jax.jit
def _dqn_forward_padded(x_p, kernel_params):
    """x_p: (Bp, INPUT_DIM) f32 with Bp a multiple of the chosen batch tile."""
    w1, b1, w2, b2, w3, b3 = kernel_params
    Bp = x_p.shape[0]
    TB, n_steps, _ = _choose_tiling(Bp)
    assert TB * n_steps == Bp

    flops = 2 * Bp * (INPUT_DIM * HIDDEN_DIM + HIDDEN_DIM * HIDDEN_DIM
                      + HIDDEN_DIM * OUTPUT_DIM)
    bytes_accessed = (
        Bp * INPUT_DIM * 4 + Bp * OUTPUT_DIM * 4                       # x, out (f32)
        + (INPUT_DIM * HIDDEN_DIM + HIDDEN_DIM * HIDDEN_DIM
           + HIDDEN_DIM * OUTPUT_DIM) * 2                              # weights bf16
        + (2 * HIDDEN_DIM + OUTPUT_DIM) * 4                            # biases f32
    )

    return pl.pallas_call(
        _dqn_kernel,
        out_shape=jax.ShapeDtypeStruct((Bp, OUTPUT_DIM), jnp.float32),
        grid=(n_steps,),
        in_specs=[
            pl.BlockSpec((TB, INPUT_DIM), lambda i: (i, 0)),           # x tile (pipelined)
            pl.BlockSpec((INPUT_DIM, HIDDEN_DIM), lambda i: (0, 0)),   # w1 (resident)
            pl.BlockSpec((1, HIDDEN_DIM), lambda i: (0, 0)),           # b1
            pl.BlockSpec((HIDDEN_DIM, HIDDEN_DIM), lambda i: (0, 0)),  # w2
            pl.BlockSpec((1, HIDDEN_DIM), lambda i: (0, 0)),           # b2
            pl.BlockSpec((HIDDEN_DIM, OUTPUT_DIM), lambda i: (0, 0)),  # w3
            pl.BlockSpec((1, OUTPUT_DIM), lambda i: (0, 0)),           # b3
        ],
        out_specs=pl.BlockSpec((TB, OUTPUT_DIM), lambda i: (i, 0)),
        compiler_params=pltpu.CompilerParams(
            dimension_semantics=("parallel",)),
        cost_estimate=pl.CostEstimate(flops=flops, transcendentals=0,
                                      bytes_accessed=bytes_accessed),
    )(x_p, w1, b1, w2, b2, w3, b3)


def dqn_forward(x, kernel_params):
    """Fused MLP forward. x: (B, INPUT_DIM) f32. Returns (B, OUTPUT_DIM) f32."""
    B = x.shape[0]
    _, _, Bp = _choose_tiling(B)
    x_in = x if Bp == B else jnp.pad(x, ((0, Bp - B), (0, 0)))
    out = _dqn_forward_padded(x_in, kernel_params)
    return out if Bp == B else out[:B]


def reference_forward(x, params):
    """Pure-JAX reference with the same bf16-input / f32-accumulate matmul recipe."""
    w1, b1, w2, b2, w3, b3 = params
    bf = jnp.bfloat16
    h1 = jnp.dot(x.astype(bf), w1.astype(bf), preferred_element_type=jnp.float32) + b1
    h1 = jnp.maximum(h1, 0.0)
    h2 = jnp.dot(h1.astype(bf), w2.astype(bf), preferred_element_type=jnp.float32) + b2
    h2 = jnp.maximum(h2, 0.0)
    return jnp.dot(h2.astype(bf), w3.astype(bf), preferred_element_type=jnp.float32) + b3


if __name__ == "__main__":
    key = jax.random.PRNGKey(0)
    k_params, k_x1, k_x2 = jax.random.split(key, 3)

    params = init_params(k_params)
    kernel_params = prepare_params(params)

    # Small, aligned batch (single grid step).
    batch = 8
    x = jax.random.normal(k_x1, (batch, INPUT_DIM), jnp.float32)
    out = jax.block_until_ready(dqn_forward(x, kernel_params))
    ref = reference_forward(x, params)
    assert out.shape == (batch, OUTPUT_DIM)
    assert jnp.allclose(out, ref, atol=2e-3, rtol=2e-3), \
        float(jnp.max(jnp.abs(out - ref)))

    # Ragged batch (exercises adaptive tiling + tail padding path).
    batch2 = 37
    x2 = jax.random.normal(k_x2, (batch2, INPUT_DIM), jnp.float32)
    out2 = jax.block_until_ready(dqn_forward(x2, kernel_params))
    ref2 = reference_forward(x2, params)
    assert out2.shape == (batch2, OUTPUT_DIM)
    assert jnp.allclose(out2, ref2, atol=2e-3, rtol=2e-3), \
        float(jnp.max(jnp.abs(out2 - ref2)))

    print("KERNEL_OK")
</pallas_src>

<mosaic_0001>
module attributes {stable_mosaic.version = 11 : i64} {
  func.func @_dqn_kernel(%arg0: i32, %arg1: memref<8x72xf32, #tpu.memory_space<vmem>>, %arg2: memref<72x128xbf16, #tpu.memory_space<vmem>>, %arg3: memref<1x128xf32, #tpu.memory_space<vmem>>, %arg4: memref<128x128xbf16, #tpu.memory_space<vmem>>, %arg5: memref<1x128xf32, #tpu.memory_space<vmem>>, %arg6: memref<128x72xbf16, #tpu.memory_space<vmem>>, %arg7: memref<1x72xf32, #tpu.memory_space<vmem>>, %arg8: memref<8x72xf32, #tpu.memory_space<vmem>>) attributes {dimension_semantics = [#tpu.dimension_semantics<parallel>], iteration_bounds = array<i64: 1>, scalar_prefetch = 0 : i64, scratch_operands = 0 : i64, tpu.core_type = #tpu.core_type<tc>, window_params = [{transform_indices = @transform_0, window_bounds = array<i64: 8, 72>}, {pipeline_mode = #tpu.pipeline_mode<synchronous>, transform_indices = @transform_1, window_bounds = array<i64: 72, 128>}, {pipeline_mode = #tpu.pipeline_mode<synchronous>, transform_indices = @transform_2, window_bounds = array<i64: 1, 128>}, {pipeline_mode = #tpu.pipeline_mode<synchronous>, transform_indices = @transform_3, window_bounds = array<i64: 128, 128>}, {pipeline_mode = #tpu.pipeline_mode<synchronous>, transform_indices = @transform_4, window_bounds = array<i64: 1, 128>}, {pipeline_mode = #tpu.pipeline_mode<synchronous>, transform_indices = @transform_5, window_bounds = array<i64: 128, 72>}, {pipeline_mode = #tpu.pipeline_mode<synchronous>, transform_indices = @transform_6, window_bounds = array<i64: 1, 72>}, {transform_indices = @transform_7, window_bounds = array<i64: 8, 72>}]} {
    %c0 = arith.constant 0 : index
    %c0_0 = arith.constant 0 : index
    %0 = vector.load %arg1[%c0, %c0_0] : memref<8x72xf32, #tpu.memory_space<vmem>>, vector<8x72xf32>
    %1 = arith.truncf %0 : vector<8x72xf32> to vector<8x72xbf16>
    %c0_1 = arith.constant 0 : index
    %c0_2 = arith.constant 0 : index
    %2 = vector.load %arg2[%c0_1, %c0_2] : memref<72x128xbf16, #tpu.memory_space<vmem>>, vector<72x128xbf16>
    %cst = arith.constant dense<0.000000e+00> : vector<8x128xf32>
    %3 = tpu.matmul %1, %2, %cst {dimension_numbers = #tpu.dot_dimension_numbers<[1], [0], [0], [1], [0, 0, 1, 1], [], []>} : vector<8x72xbf16>, vector<72x128xbf16>, vector<8x128xf32> -> vector<8x128xf32>
    %c0_3 = arith.constant 0 : index
    %c0_4 = arith.constant 0 : index
    %4 = vector.load %arg3[%c0_3, %c0_4] : memref<1x128xf32, #tpu.memory_space<vmem>>, vector<1x128xf32>
    %5 = vector.broadcast %4 : vector<1x128xf32> to vector<8x128xf32>
    %6 = arith.addf %3, %5 : vector<8x128xf32>
    %cst_5 = arith.constant 0.000000e+00 : f32
    %7 = vector.broadcast %cst_5 : f32 to vector<8x128xf32>
    %8 = arith.maximumf %6, %7 : vector<8x128xf32>
    %9 = arith.truncf %8 : vector<8x128xf32> to vector<8x128xbf16>
    %c0_6 = arith.constant 0 : index
    %c0_7 = arith.constant 0 : index
    %10 = vector.load %arg4[%c0_6, %c0_7] : memref<128x128xbf16, #tpu.memory_space<vmem>>, vector<128x128xbf16>
    %cst_8 = arith.constant dense<0.000000e+00> : vector<8x128xf32>
    %11 = tpu.matmul %9, %10, %cst_8 {dimension_numbers = #tpu.dot_dimension_numbers<[1], [0], [0], [1], [0, 0, 1, 1], [], []>} : vector<8x128xbf16>, vector<128x128xbf16>, vector<8x128xf32> -> vector<8x128xf32>
    %c0_9 = arith.constant 0 : index
    %c0_10 = arith.constant 0 : index
    %12 = vector.load %arg5[%c0_9, %c0_10] : memref<1x128xf32, #tpu.memory_space<vmem>>, vector<1x128xf32>
    %13 = vector.broadcast %12 : vector<1x128xf32> to vector<8x128xf32>
    %14 = arith.addf %11, %13 : vector<8x128xf32>
    %cst_11 = arith.constant 0.000000e+00 : f32
    %15 = vector.broadcast %cst_11 : f32 to vector<8x128xf32>
    %16 = arith.maximumf %14, %15 : vector<8x128xf32>
    %17 = arith.truncf %16 : vector<8x128xf32> to vector<8x128xbf16>
    %c0_12 = arith.constant 0 : index
    %c0_13 = arith.constant 0 : index
    %18 = vector.load %arg6[%c0_12, %c0_13] : memref<128x72xbf16, #tpu.memory_space<vmem>>, vector<128x72xbf16>
    %cst_14 = arith.constant dense<0.000000e+00> : vector<8x72xf32>
    %19 = tpu.matmul %17, %18, %cst_14 {dimension_numbers = #tpu.dot_dimension_numbers<[1], [0], [0], [1], [0, 0, 1, 1], [], []>} : vector<8x128xbf16>, vector<128x72xbf16>, vector<8x72xf32> -> vector<8x72xf32>
    %c0_15 = arith.constant 0 : index
    %c0_16 = arith.constant 0 : index
    %20 = vector.load %arg7[%c0_15, %c0_16] : memref<1x72xf32, #tpu.memory_space<vmem>>, vector<1x72xf32>
    %21 = vector.broadcast %20 : vector<1x72xf32> to vector<8x72xf32>
    %22 = arith.addf %19, %21 : vector<8x72xf32>
    %c0_17 = arith.constant 0 : index
    %c0_18 = arith.constant 0 : index
    %23 = vector.load %arg8[%c0_17, %c0_18] : memref<8x72xf32, #tpu.memory_space<vmem>>, vector<8x72xf32>
    tpu.vector_store %arg8[%c0_17, %c0_18], %22 {strides = array<i32>} : memref<8x72xf32, #tpu.memory_space<vmem>>, vector<8x72xf32>,
    return
  }
  func.func @transform_0(%arg0: i32) -> (i32, i32) {
    %c0_i32 = arith.constant 0 : i32
    %c0_i32_0 = arith.constant 0 : i32
    return %arg0, %c0_i32 : i32, i32
  }
  func.func @transform_1(%arg0: i32) -> (i32, i32) {
    %c0_i32 = arith.constant 0 : i32
    %c0_i32_0 = arith.constant 0 : i32
    %c0_i32_1 = arith.constant 0 : i32
    return %c0_i32, %c0_i32_0 : i32, i32
  }
  func.func @transform_2(%arg0: i32) -> (i32, i32) {
    %c0_i32 = arith.constant 0 : i32
    %c0_i32_0 = arith.constant 0 : i32
    %c0_i32_1 = arith.constant 0 : i32
    return %c0_i32, %c0_i32_0 : i32, i32
  }
  func.func @transform_3(%arg0: i32) -> (i32, i32) {
    %c0_i32 = arith.constant 0 : i32
    %c0_i32_0 = arith.constant 0 : i32
    %c0_i32_1 = arith.constant 0 : i32
    return %c0_i32, %c0_i32_0 : i32, i32
  }
  func.func @transform_4(%arg0: i32) -> (i32, i32) {
    %c0_i32 = arith.constant 0 : i32
    %c0_i32_0 = arith.constant 0 : i32
    %c0_i32_1 = arith.constant 0 : i32
    return %c0_i32, %c0_i32_0 : i32, i32
  }
  func.func @transform_5(%arg0: i32) -> (i32, i32) {
    %c0_i32 = arith.constant 0 : i32
    %c0_i32_0 = arith.constant 0 : i32
    %c0_i32_1 = arith.constant 0 : i32
    return %c0_i32, %c0_i32_0 : i32, i32
  }
  func.func @transform_6(%arg0: i32) -> (i32, i32) {
    %c0_i32 = arith.constant 0 : i32
    %c0_i32_0 = arith.constant 0 : i32
    %c0_i32_1 = arith.constant 0 : i32
    return %c0_i32, %c0_i32_0 : i32, i32
  }
  func.func @transform_7(%arg0: i32) -> (i32, i32) {
    %c0_i32 = arith.constant 0 : i32
    %c0_i32_0 = arith.constant 0 : i32
    return %arg0, %c0_i32 : i32, i32
  }
}

</mosaic_0001>

<bundles_post_ra>
// kernel: _dqn_forward_padded.1
= control target key start
LH: loop header
LB: loop body
LE: loop exit
PB: predicated region body
PF: predicated region fallthrough
CT: control target
= control target key end

     0   :  { %v513_v1 = vmov 0.0   ;;  %vm514_vm0 = vmmov 0   ;;  %vm77_vm1 = vcmask 1043456   ;;  %vm73_vm2 = vcmask 588800   ;;  %s672_s0 = inlined_call_operand.vmem [shape: f32[8,72], index: 0, kind: input, shape index: {}]   ;;  %s673_s1 = inlined_call_operand.vmem [shape: bf16[72,128], index: 1, kind: input, shape index: {}]   ;;  %s674_s2 = inlined_call_operand.vmem [shape: f32[1,128], index: 2, kind: input, shape index: {}]   ;;  %s675_s3 = inlined_call_operand.vmem [shape: bf16[128,128], index: 3, kind: input, shape index: {}]   ;;  %s676_s4 = inlined_call_operand.vmem [shape: f32[1,128], index: 4, kind: input, shape index: {}]   ;;  %s677_s5 = inlined_call_operand.vmem [shape: bf16[128,72], index: 5, kind: input, shape index: {}]   ;;  %s678_s6 = inlined_call_operand.vmem [shape: f32[1,72], index: 6, kind: input, shape index: {}]   ;;  %s679_s7 = inlined_call_operand.hbm [shape: f32[8,72], index: 7, kind: output, shape index: {}]  }
   0x1   :  { %v468_v0 = vld [vmem:[%s673_s1] sm:$0xff]   ;;  %411 = vmatprep.subr.bf16.mxu0 %v513_v1  ;;  %425 = vmatprep.subr.bf16.mxu1 %v513_v1  ;;  %v469_v2 = vld [vmem:[%s673_s1 + $0x8] sm:$0xff]   ;;  %v470_v3 = vld [vmem:[%s673_s1 + $0x10] sm:$0xff]  }
   0x2   :  { %412 = vmatpush3.bf16.msra.mxu0 %v468_v0  ;;  %421 = vmatprep.mubr.msk.bf16.mxu0 %vm514_vm0, %v513_v1  ;;  %v473_v4 = vld [vmem:[%s675_s3] sm:$0xff]   ;;  %v474_v6 = vld [vmem:[%s675_s3 + $0x8] sm:$0xff]   ;;  %v471_v7 = vld [vmem:[%s673_s1 + $0x18] sm:$0xff]  }
   0x3   :  { %413 = vmatprep.subr.bf16.mxu0 %v513_v1  ;;  %441 = vmatprep.mubr.msk.bf16.mxu1 %vm514_vm0, %v513_v1  ;;  %v472_v5 = vld [vmem:[%s673_s1 + $0x20] ss:$0 sps:$4 sm:$0xff]   ;;  %v475_v9 = vld [vmem:[%s675_s3 + $0x10] sm:$0xff]   ;;  %v476_v11 = vld [vmem:[%s675_s3 + $0x18] sm:$0xff]  }
   0x4   :  { %426 = vmatpush3.bf16.msra.mxu1 %v473_v4  ;;  %v79_v8 = vsel %vm77_vm1, %v472_v5, 0  ;;  %v28_v10 = vld [vmem:[%s672_s0] sm:$0xff] }
   0x5   :  { %427 = vmatprep.subr.bf16.mxu1 %v513_v1  ;;  %v29_v12 = vpack.c.bf16 %v28_v10, %v28_v10 }
   0x6   :  { %414 = vmatpush3.bf16.msra.mxu0 %v469_v2 }
   0x7   :  { %415 = vmatprep.subr.bf16.mxu0 %v513_v1 }
   0x8   :  { %428 = vmatpush3.bf16.msra.mxu1 %v474_v6 }
   0x9   :  { %429 = vmatprep.subr.bf16.mxu1 %v513_v1 }
   0xa   :  { %416 = vmatpush3.bf16.msra.mxu0 %v470_v3 }
   0xb   :  { %417 = vmatprep.subr.bf16.mxu0 %v513_v1 }
   0xc   :  { %430 = vmatpush3.bf16.msra.mxu1 %v475_v9 }
   0xd   :  { %431 = vmatprep.subr.bf16.mxu1 %v513_v1 }
   0xe   :  { %418 = vmatpush3.bf16.msra.mxu0 %v471_v7 }
   0xf   :  { %419 = vmatprep.subr.bf16.mxu0 %v513_v1 }
  0x12   :  { %420 = vmatpush3.bf16.msra.mxu0 %v79_v8 }
  0x13   :  { %12 = vsyncpa [#allocation3], 0  ;;  %432 = vmatpush3.bf16.msra.mxu1 %v476_v11  ;;  %v477_v13 = vld [vmem:[%s675_s3 + $0x20] sm:$0xff]   ;;  %445 = vmatprep.subr.bf16.mxu0 %v513_v1  ;;  %v478_v14 = vld [vmem:[%s675_s3 + $0x28] sm:$0xff]   ;;  %s515_s22 = smov [#allocation2]  }
  0x14   :  { %433 = vmatprep.subr.bf16.mxu1 %v513_v1  ;;  %v479_v15 = vld [vmem:[%s675_s3 + $0x30] sm:$0xff]   ;;  %v480_v16 = vld [vmem:[%s675_s3 + $0x38] sm:$0xff]   ;;  %v481_v17 = vld [vmem:[%s677_s5] sm:$0xff]   ;;  %s354_s23 = sshll.u32 %s515_s22, 4  ;;  %s355_s23 = int_to_ptr.vmem [resolvable:$true] %s354_s23 }
  0x15   :  { %422 = vmatmul.mubr.msk.bf16.vlgmr.msra.gmra.mrb[0].mxu0 %vm73_vm2, %v29_v12  ;;  %v482_v18 = vld [vmem:[%s677_s5 + $0x8] sm:$0xff]   ;;  %v483_v19 = vld [vmem:[%s677_s5 + $0x10] sm:$0xff]   ;;  %v484_v20 = vld [vmem:[%s677_s5 + $0x18] sm:$0xff]   ;;  %p494_p1 = scmp.lt.s32.totalorder %s355_s23, %s355_s23 }
  0x16   :  { %461 = vmatprep.mubr.msk.bf16.mxu0 %vm514_vm0, %v513_v1  ;;  %446 = vmatpush3.bf16.msra.mxu0 %v481_v17  ;;  %v485_v21 = vld [vmem:[%s677_s5 + $0x20] sm:$0xff]   ;;  %v486_v22 = vld [vmem:[%s677_s5 + $0x28] sm:$0xff]   ;;  %v487_v31 = vld [vmem:[%s677_s5 + $0x30] sm:$0xff]  }
  0x17   :  { %434 = vmatpush3.bf16.msra.mxu1 %v477_v13  ;;  %447 = vmatprep.subr.bf16.mxu0 %v513_v1  ;;  %v362_v23 = vld [vmem:[%s674_s2] ss:$0 sm:$0xff]  ;;  %v488_v32 = vld [vmem:[%s677_s5 + $0x38] sm:$0xff]  }
  0x18   :  { %435 = vmatprep.subr.bf16.mxu1 %v513_v1  ;;  %v369_v33 = vld [vmem:[%s676_s4] ss:$0 sm:$0xff]  ;;  %s489_s4 = scalar_lea.vmem %s355_s23, 128 }
  0x19   :  { %v378_v41 = vld [vmem:[%s678_s6] ss:$0 sm:$0xff]  ;;  %p490_p0 = scmp.ne.s32.totalorder %s355_s23, %s489_s4  ;;  %p495_p2 = scmp.lt.s32.totalorder %s489_s4, %s489_s4 }
  0x1a   :  { %448 = vmatpush3.bf16.msra.mxu0 %v482_v18 }
  0x1b   :  { %436 = vmatpush3.bf16.msra.mxu1 %v478_v14  ;;  %449 = vmatprep.subr.bf16.mxu0 %v513_v1  ;;  %p496_p3 = por %p495_p2, %p494_p1 }
  0x1c   :  { %437 = vmatprep.subr.bf16.mxu1 %v513_v1 }
  0x1d   :  { %p497_p4 = pnand %p496_p3, %p490_p0 }
  0x1e   :  { %450 = vmatpush3.bf16.msra.mxu0 %v483_v19 }
  0x1f   :  { %438 = vmatpush3.bf16.msra.mxu1 %v479_v15  ;;  %451 = vmatprep.subr.bf16.mxu0 %v513_v1 }
  0x20   :  { %439 = vmatprep.subr.bf16.mxu1 %v513_v1 }
  0x22   :  { %452 = vmatpush3.bf16.msra.mxu0 %v484_v20 }
  0x23   :  { %440 = vmatpush3.bf16.msra.mxu1 %v480_v16  ;;  %453 = vmatprep.subr.bf16.mxu0 %v513_v1 }
  0x26   :  { %454 = vmatpush3.bf16.msra.mxu0 %v485_v21 }
  0x27   :  { %455 = vmatprep.subr.bf16.mxu0 %v513_v1 }
  0x2a   :  { %456 = vmatpush3.bf16.msra.mxu0 %v486_v22 }
  0x2b   :  { %457 = vmatprep.subr.bf16.mxu0 %v513_v1 }
  0x2e   :  { %458 = vmatpush3.bf16.msra.mxu0 %v487_v31 }
  0x2f   :  { %459 = vmatprep.subr.bf16.mxu0 %v513_v1 }
  0x32   :  { %460 = vmatpush3.bf16.msra.mxu0 %v488_v32 }
  0xe8   :  { %v115_v24 = vpop.f32.mrb[0].mxu0 }
  0xe9   :  { %v116_v25 = vadd.f32 %v362_v23, %v115_v24  ;;  %v423_v26 = vpop.f32.mrb[1].mxu0 }
  0xea   :  { %v118_v27 = vpop.f32.mrb[2].mxu0 }
  0xeb   :  { %v121_v28 = vmax.f32 %v116_v25, 0.0  ;;  %v424_v29 = vpop.f32.mrb[3].mxu0 }
  0xed   :  { %v122_v30 = vpack.c.bf16 %v121_v28, %v121_v28 }
  0xef   :  { %442 = vmatmul.mubr.bf16.vlgmr.msra.gmra.mrb[0].mxu1 %v122_v30 }
 0x1c2   :  { %v228_v34 = vpop.f32.mrb[0].mxu1 }
 0x1c3   :  { %v229_v35 = vadd.f32 %v369_v33, %v228_v34  ;;  %v443_v36 = vpop.f32.mrb[1].mxu1 }
 0x1c4   :  { %v231_v37 = vpop.f32.mrb[2].mxu1 }
 0x1c5   :  { %v234_v38 = vmax.f32 %v229_v35, 0.0  ;;  %v444_v39 = vpop.f32.mrb[3].mxu1 }
 0x1c7   :  { %v235_v40 = vpack.c.bf16 %v234_v38, %v234_v38 }
 0x1c9   :  { %462 = vmatmul.mubr.bf16.vlgmr.msra.gmra.mrb[4].mxu0 %v235_v40 }
 0x29c   :  { %v341_v42 = vpop.f32.mrb[4].mxu0 }
 0x29d   :  { %v342_v43 = vadd.f32 %v378_v41, %v341_v42  ;;  %v463_v44 = vpop.f32.mrb[5].mxu0 }
 0x29e   :  { %v344_v45 = vpop.f32.mrb[6].mxu0 }
 0x29f   :  { %347 = vst.msk [vmem:[#allocation2] sm:$0xff] %vm73_vm2, %v342_v43  ;;  %v464_v46 = vpop.f32.mrb[7].mxu0 }
 0x2a0   :  { %500 = shalt.err (!%p497_p4)
}
 0x2a1   :  { %s501_s6 = scalar_lea.hbm %s679_s7, 128 }
 0x2a2   :  { %p502_p5 = scmp.ne.s32.totalorder %s679_s7, %s501_s6  ;;  %p505_p6 = scmp.lt.u32.totalorder %s501_s6, %s679_s7 }
 0x2a4   :  { %p507_p7 = pnand %p505_p6, %p502_p5 }
 0x2a6   :  { %510 = shalt.err (!%p507_p7)
}
 0x2a7   :  { %357 = dma.vmem_to_hbm [thread:$0]  %s355_s23, 128, %s679_s7, [#allocation3]  }
 0x2a8   :  { %511 = dma.done.wait [#allocation3], 128  }
 0x2a9   :  { %512 = vsyncadd [#allocation3], 4294967168 }
 0x2aa   :  { %361 = vsyncpa [#allocation3], 1 }

</bundles_post_ra>
